<compile_context>
chip_gen: v5e
topology: v5e:2x2
jax: 0.10.0
libtpu: 0.0.40
codegen_flags: <defaults>
</compile_context>

<pallas_src>
import jax
import jax.numpy as jnp
from jax.experimental import pallas as pl
from jax.experimental.pallas import tpu as pltpu


def _round_up(n, m):
    return ((n + m - 1) // m) * m


def _linear_kernel(x_ref, w_ref, b_ref, o_ref, acc_ref):
    # x_ref: (tm, tk) bf16, w_ref: (tk, Np) bf16, b_ref: (1, Np) f32,
    # o_ref: (tm, Np) f32, acc_ref: (tm, Np) f32 scratch.
    k = pl.program_id(1)

    @pl.when(k == 0)
    def _():
        acc_ref[...] = jnp.zeros_like(acc_ref)

    acc_ref[...] += jnp.dot(
        x_ref[...], w_ref[...], preferred_element_type=jnp.float32
    )

    @pl.when(k == pl.num_programs(1) - 1)
    def _():
        # Bias add in f32 (VPU path stays f32-friendly on v5e).
        o_ref[...] = (acc_ref[...] + b_ref[...]).astype(o_ref.dtype)


def gplinear_kl_forward(x, weight, bias, *, tm=512, tk=512,
                        compute_dtype=jnp.bfloat16):
    """nn.Linear forward: x @ weight.T + bias.

    x      : (B, n_loci)        float32
    weight : (n_phen, n_loci)   float32  (PyTorch layout)
    bias   : (n_phen,)          float32
    returns (B, n_phen)         float32
    """
    B, n_loci = x.shape
    n_phen, n_loci_w = weight.shape
    assert n_loci == n_loci_w
    assert bias.shape == (n_phen,)

    # --- padded / tiled shapes -------------------------------------------
    # Lane-dense output: pad n_phen up to a multiple of 128.
    n_phen_p = _round_up(n_phen, 128)
    # Row tile: multiple of 16 (bf16 sublane packing); cap at `tm`.
    B_p = _round_up(B, 16)
    tm = min(tm, B_p)
    B_p = _round_up(B_p, tm)
    # K tile: multiple of 128; cap at `tk`.
    n_loci_p = _round_up(n_loci, 128)
    tk = min(tk, n_loci_p)
    n_loci_p = _round_up(n_loci_p, tk)

    # --- operand prep (zero padding is exact for the matmul) -------------
    x_p = jnp.pad(x.astype(compute_dtype),
                  ((0, B_p - B), (0, n_loci_p - n_loci)))
    w_t = weight.T.astype(compute_dtype)                      # (n_loci, n_phen)
    w_p = jnp.pad(w_t, ((0, n_loci_p - n_loci), (0, n_phen_p - n_phen)))
    b_p = jnp.pad(bias.astype(jnp.float32).reshape(1, n_phen),
                  ((0, 0), (0, n_phen_p - n_phen)))

    grid = (B_p // tm, n_loci_p // tk)   # reduction (K) axis last

    out_p = pl.pallas_call(
        _linear_kernel,
        out_shape=jax.ShapeDtypeStruct((B_p, n_phen_p), jnp.float32),
        grid=grid,
        in_specs=[
            pl.BlockSpec((tm, tk), lambda i, k: (i, k)),          # x tile
            pl.BlockSpec((tk, n_phen_p), lambda i, k: (k, 0)),    # weight tile
            pl.BlockSpec((1, n_phen_p), lambda i, k: (0, 0)),     # bias (resident)
        ],
        out_specs=pl.BlockSpec((tm, n_phen_p), lambda i, k: (i, 0)),
        scratch_shapes=[pltpu.VMEM((tm, n_phen_p), jnp.float32)],
        compiler_params=pltpu.CompilerParams(
            dimension_semantics=("parallel", "arbitrary"),
        ),
    )(x_p, w_p, b_p)

    # Slice away batch / lane padding; keep the module's f32 output dtype.
    return out_p[:B, :n_phen].astype(x.dtype)


if __name__ == "__main__":
    # Module hyperparameters (synthetic, deterministic):
    qtl_n = 64
    n_loci = int(qtl_n) * 2   # 128
    n_phen = 5
    batch = 8

    key = jax.random.PRNGKey(0)
    kx, kw, kb = jax.random.split(key, 3)

    # Deterministic "initialization" mimicking nn.Linear's uniform(-1/sqrt(in), 1/sqrt(in)).
    bound = 1.0 / (n_loci ** 0.5)
    x = jax.random.normal(kx, (batch, n_loci), dtype=jnp.float32)
    weight = jax.random.uniform(kw, (n_phen, n_loci), dtype=jnp.float32,
                                minval=-bound, maxval=bound)  # PyTorch layout
    bias = jax.random.uniform(kb, (n_phen,), dtype=jnp.float32,
                              minval=-bound, maxval=bound)

    out = gplinear_kl_forward(x, weight, bias)
    out = jax.block_until_ready(out)

    # Reference check (plain JAX / equals PyTorch F.linear semantics).
    # bf16 matmul operands -> relaxed tolerance vs the f32 reference.
    ref = x @ weight.T + bias
    assert out.shape == (batch, n_phen)
    assert out.dtype == x.dtype
    assert jnp.allclose(out, ref, atol=3e-2, rtol=3e-2), (
        float(jnp.max(jnp.abs(out - ref))))

    print("KERNEL_OK")
</pallas_src>

<mosaic_0001>
module attributes {stable_mosaic.version = 11 : i64} {
  func.func @_linear_kernel(%arg0: i32, %arg1: i32, %arg2: memref<16x128xbf16, #tpu.memory_space<vmem>>, %arg3: memref<128x128xbf16, #tpu.memory_space<vmem>>, %arg4: memref<1x128xf32, #tpu.memory_space<vmem>>, %arg5: memref<16x128xf32, #tpu.memory_space<vmem>>, %arg6: memref<16x128xf32, #tpu.memory_space<vmem>>) attributes {dimension_semantics = [#tpu.dimension_semantics<parallel>, #tpu.dimension_semantics<arbitrary>], iteration_bounds = array<i64: 1, 1>, scalar_prefetch = 0 : i64, scratch_operands = 1 : i64, tpu.core_type = #tpu.core_type<tc>, window_params = [{transform_indices = @transform_0, window_bounds = array<i64: 16, 128>}, {transform_indices = @transform_1, window_bounds = array<i64: 128, 128>}, {pipeline_mode = #tpu.pipeline_mode<synchronous>, transform_indices = @transform_2, window_bounds = array<i64: 1, 128>}, {transform_indices = @transform_3, window_bounds = array<i64: 16, 128>}]} {
    %c0_i32 = arith.constant 0 : i32
    %0 = arith.cmpi eq, %arg1, %c0_i32 : i32
    %1 = arith.extui %0 : i1 to i32
    %c0_i32_0 = arith.constant 0 : i32
    %2 = arith.cmpi ne, %1, %c0_i32_0 : i32
    scf.if %2 {
      %cst_10 = arith.constant 0.000000e+00 : f32
      %12 = vector.broadcast %cst_10 : f32 to vector<16x128xf32>
      %c0_11 = arith.constant 0 : index
      %c0_12 = arith.constant 0 : index
      %13 = vector.load %arg6[%c0_11, %c0_12] : memref<16x128xf32, #tpu.memory_space<vmem>>, vector<16x128xf32>
      tpu.vector_store %arg6[%c0_11, %c0_12], %12 {strides = array<i32>} : memref<16x128xf32, #tpu.memory_space<vmem>>, vector<16x128xf32>,
    } else {
    }
    %c0 = arith.constant 0 : index
    %c0_1 = arith.constant 0 : index
    %3 = vector.load %arg6[%c0, %c0_1] : memref<16x128xf32, #tpu.memory_space<vmem>>, vector<16x128xf32>
    %c0_2 = arith.constant 0 : index
    %c0_3 = arith.constant 0 : index
    %4 = vector.load %arg2[%c0_2, %c0_3] : memref<16x128xbf16, #tpu.memory_space<vmem>>, vector<16x128xbf16>
    %c0_4 = arith.constant 0 : index
    %c0_5 = arith.constant 0 : index
    %5 = vector.load %arg3[%c0_4, %c0_5] : memref<128x128xbf16, #tpu.memory_space<vmem>>, vector<128x128xbf16>
    %cst = arith.constant dense<0.000000e+00> : vector<16x128xf32>
    %6 = tpu.matmul %4, %5, %cst {dimension_numbers = #tpu.dot_dimension_numbers<[1], [0], [0], [1], [0, 0, 1, 1], [], []>} : vector<16x128xbf16>, vector<128x128xbf16>, vector<16x128xf32> -> vector<16x128xf32>
    %7 = arith.addf %3, %6 : vector<16x128xf32>
    %c0_6 = arith.constant 0 : index
    %c0_7 = arith.constant 0 : index
    %8 = vector.load %arg6[%c0_6, %c0_7] : memref<16x128xf32, #tpu.memory_space<vmem>>, vector<16x128xf32>
    tpu.vector_store %arg6[%c0_6, %c0_7], %7 {strides = array<i32>} : memref<16x128xf32, #tpu.memory_space<vmem>>, vector<16x128xf32>,
    %c0_i32_8 = arith.constant 0 : i32
    %9 = arith.cmpi eq, %arg1, %c0_i32_8 : i32
    %10 = arith.extui %9 : i1 to i32
    %c0_i32_9 = arith.constant 0 : i32
    %11 = arith.cmpi ne, %10, %c0_i32_9 : i32
    scf.if %11 {
      %c0_10 = arith.constant 0 : index
      %c0_11 = arith.constant 0 : index
      %12 = vector.load %arg6[%c0_10, %c0_11] : memref<16x128xf32, #tpu.memory_space<vmem>>, vector<16x128xf32>
      %c0_12 = arith.constant 0 : index
      %c0_13 = arith.constant 0 : index
      %13 = vector.load %arg4[%c0_12, %c0_13] : memref<1x128xf32, #tpu.memory_space<vmem>>, vector<1x128xf32>
      %14 = vector.broadcast %13 : vector<1x128xf32> to vector<16x128xf32>
      %15 = arith.addf %12, %14 : vector<16x128xf32>
      %c0_14 = arith.constant 0 : index
      %c0_15 = arith.constant 0 : index
      %16 = vector.load %arg5[%c0_14, %c0_15] : memref<16x128xf32, #tpu.memory_space<vmem>>, vector<16x128xf32>
      tpu.vector_store %arg5[%c0_14, %c0_15], %15 {strides = array<i32>} : memref<16x128xf32, #tpu.memory_space<vmem>>, vector<16x128xf32>,
    } else {
    }
    return
  }
  func.func @transform_0(%arg0: i32, %arg1: i32) -> (i32, i32) {
    %c0_i32 = arith.constant 0 : i32
    return %arg0, %arg1 : i32, i32
  }
  func.func @transform_1(%arg0: i32, %arg1: i32) -> (i32, i32) {
    %c0_i32 = arith.constant 0 : i32
    %c0_i32_0 = arith.constant 0 : i32
    return %arg1, %c0_i32 : i32, i32
  }
  func.func @transform_2(%arg0: i32, %arg1: i32) -> (i32, i32) {
    %c0_i32 = arith.constant 0 : i32
    %c0_i32_0 = arith.constant 0 : i32
    %c0_i32_1 = arith.constant 0 : i32
    return %c0_i32, %c0_i32_0 : i32, i32
  }
  func.func @transform_3(%arg0: i32, %arg1: i32) -> (i32, i32) {
    %c0_i32 = arith.constant 0 : i32
    %c0_i32_0 = arith.constant 0 : i32
    return %arg0, %c0_i32 : i32, i32
  }
}

</mosaic_0001>

<bundles_post_ra>
// kernel: tpu_custom_call.1
= control target key start
LH: loop header
LB: loop body
LE: loop exit
PB: predicated region body
PF: predicated region fallthrough
CT: control target
= control target key end

     0   :  { %8 = vsyncpa [#allocation4], 0  ;;  %s348_s0 = inlined_call_operand.hbm [shape: bf16[16,128], index: 0, kind: input, shape index: {}]   ;;  %s349_s1 = inlined_call_operand.hbm [shape: bf16[128,128], index: 1, kind: input, shape index: {}]   ;;  %s350_s2 = inlined_call_operand.vmem [shape: f32[1,128], index: 2, kind: input, shape index: {}]   ;;  %s351_s3 = inlined_call_operand.hbm [shape: f32[16,128], index: 3, kind: output, shape index: {}]  }
   0x1   :  { %9 = vsyncpa [#allocation7], 0 }
   0x2   :  { %10 = vsyncpa [#allocation5], 0  ;;  %s15_s14 = sshll.u32 %s348_s0, 4  ;;  %s309_s15 = smov [#allocation3]   ;;  %s16_s14 = int_to_ptr.hbm [resolvable:$true] %s15_s14 }
   0x3   :  { %s17_s16 = sshll.u32 %s309_s15, 4  ;;  %s28_s19 = sshll.u32 %s349_s1, 4  ;;  %s18_s16 = int_to_ptr.vmem [resolvable:$true] %s17_s16  ;;  %s29_s19 = int_to_ptr.hbm [resolvable:$true] %s28_s19 }
   0x4   :  { %s310_s20 = smov 64   ;;  %s311_s21 = smov 4  }
   0x5   :  { %23 = dma.hbm_to_vmem [thread:$0]  %s16_s14, 128, %s18_s16, [#allocation4], %s310_s20, %s310_s20, %s311_s21  }
   0x6   :  { %s312_s22 = smov [#allocation6]  }
   0x7   :  { %s30_s23 = sshll.u32 %s312_s22, 4  ;;  %s31_s23 = int_to_ptr.vmem [resolvable:$true] %s30_s23 }
   0x8   :  { %36 = dma.hbm_to_vmem [thread:$0]  %s29_s19, 1024, %s31_s23, [#allocation7], %s310_s20, %s310_s20, %s311_s21  }
   0x9   :  { %303 = dma.done.wait [#allocation4], 128  }
   0xa   :  { %304 = vsyncadd [#allocation4], 4294967168 }
   0xb   :  { %305 = dma.done.wait [#allocation7], 1024  }
   0xc   :  { %306 = vsyncadd [#allocation7], 4294966272  ;;  %v222_v0 = vld [vmem:[#allocation6 + $0x38] sm:$0xff]  ;;  %v221_v1 = vld [vmem:[#allocation6 + $0x30] sm:$0xff]  ;;  %s313_s24 = smov [#allocation8]   ;;  %s164_s28 = sshll.u32 %s351_s3, 4  ;;  %s165_s28 = int_to_ptr.hbm [resolvable:$true] %s164_s28 }
   0xd   :  { %127 = vmatpush.bf16.msra.mxu0 %v222_v0  ;;  %v220_v2 = vld [vmem:[#allocation6 + $0x28] sm:$0xff]  ;;  %v219_v3 = vld [vmem:[#allocation6 + $0x20] sm:$0xff]  ;;  %v218_v4 = vld [vmem:[#allocation6 + $0x18] sm:$0xff]  ;;  %s162_s25 = sshll.u32 %s313_s24, 4  ;;  %s314_s29 = smov 128   ;;  %s163_s25 = int_to_ptr.vmem [resolvable:$true] %s162_s25 }
   0xe   :  { %v217_v5 = vld [vmem:[#allocation6 + $0x10] sm:$0xff]  ;;  %v216_v6 = vld [vmem:[#allocation6 + $0x8] sm:$0xff]  ;;  %v215_v7 = vld [vmem:[#allocation6] sm:$0xff]  ;;  %s315_s30 = smov 8  }
   0xf   :  { %v214_v8 = vld [vmem:[#allocation3] sm:$0xff] }
  0x10   :  { %v230_v9 = vld [vmem:[%s350_s2] ss:$0 sm:$0xff] }
  0x11   :  { %128 = vmatpush.bf16.msra.mxu0 %v221_v1 }
  0x15   :  { %129 = vmatpush.bf16.msra.mxu0 %v220_v2 }
  0x19   :  { %130 = vmatpush.bf16.msra.mxu0 %v219_v3 }
  0x1d   :  { %131 = vmatpush.bf16.msra.mxu0 %v218_v4 }
  0x21   :  { %132 = vmatpush.bf16.msra.mxu0 %v217_v5 }
  0x25   :  { %133 = vmatpush.bf16.msra.mxu0 %v216_v6 }
  0x29   :  { %134 = vmatpush.bf16.msra.mxu0 %v215_v7 }
  0x2c   :  { %135 = vmatmul.bf16.vlgmr.msra.gmra.mxu0 %v214_v8 }
  0xa9   :  { %v136_v10 = vpop.f32.mrf.mxu0 }
  0xaa   :  { %v154_v11 = vadd.f32 %v230_v9, %v136_v10 }
  0xac   :  { %156 = vst [vmem:[#allocation8] sm:$0xff] %v154_v11 }
  0xb1   :  { %v138_v12 = vpop.f32.mrf.mxu0 }
  0xb2   :  { %v155_v13 = vadd.f32 %v230_v9, %v138_v12 }
  0xb4   :  { %157 = vst [vmem:[#allocation8 + $0x8] sm:$0xff] %v155_v13 }
  0xb5   :  { %170 = dma.vmem_to_hbm [thread:$0]  %s163_s25, 256, %s165_s28, [#allocation5], %s314_s29, %s314_s29, %s315_s30  }
  0xb6   :  { %307 = dma.done.wait [#allocation5], 256  }
  0xb7   :  { %308 = vsyncadd [#allocation5], 4294967040 }
  0xb8   :  { %175 = vsyncpa [#allocation4], 1 }
  0xb9   :  { %176 = vsyncpa [#allocation7], 1 }
  0xba   :  { %177 = vsyncpa [#allocation5], 1 }

</bundles_post_ra>
